<compile_context>
chip_gen: v7x
topology: tpu7x:2x2x1
jax: 0.10.0
libtpu: 0.0.40
codegen_flags: <defaults>
</compile_context>

<pallas_src>
import functools

import jax
import jax.numpy as jnp
from jax.experimental import pallas as pl
from jax.experimental.pallas import tpu as pltpu

# -------------------- "config" --------------------
NUM_Q_RES_FILTERS = 32   # config.NUM_Q_RES_FILTERS
R = 8                    # config.R
C = 8                    # config.C
BATCH = 2
EPS = 1e-5               # BatchNorm eps
CIN_PAD = 48             # input-channel padding (33 -> 48, bf16 tile aligned)
N_LAYERS = 9             # 4 ResBlocks x 2 convs + head conv


# -------------------- fused Pallas kernel --------------------
def fused_kernel(x_ref, w0_ref, wstk_ref, b_ref, hw_ref, hb_ref, q_ref):
    """Full QModule forward on one (C, N) activation slab, N = B*H*W = 128.

    x_ref:    (CIN_PAD, N) f32   pixel columns, channels on sublanes, zero-pad
    w0_ref:   (32, CIN_PAD) bf16 layer-0 folded conv+BN weight
    wstk_ref: (8, 32, 32) bf16   layers 1..8 folded conv+BN weights (C_out,C_in)
    b_ref:    (9, 32, 1) f32     folded conv+BN biases, layers 0..8
    hw_ref:   (N + B*32, B*32) bf16  rows [0,N): block-diag lin1 weights,
                                     rows [N,N+B*32): block-diag scalar weights
    hb_ref:   (2, B*32) f32      row 0: tiled lin1 bias, row 1: scalar bias
    q_ref:    (1, B) f32         tanh(Q)
    """
    bf16 = jnp.bfloat16
    f32 = jnp.float32

    def conv(w_bf16, h):
        # Single-pass bf16 x bf16 MXU matmul with f32 accumulate.
        return jnp.dot(w_bf16, h.astype(bf16), preferred_element_type=f32)

    x = x_ref[...]                                              # (48, N) f32

    # q_res_inp: ResBlock(33 -> 32).  residual = x.squeeze() has 33 channels,
    # out has 32 -> shapes differ -> NO skip connection (matches PyTorch).
    h = jnp.maximum(conv(w0_ref[...], x) + b_ref[0], 0.0)       # (32, N)
    y = jnp.maximum(conv(wstk_ref[0], h) + b_ref[1], 0.0)       # (32, N)

    # q_res1 / q_res2 / q_res3: ResBlock(32 -> 32) with residual add (f32).
    for i in (1, 3, 5):
        h = jnp.maximum(conv(wstk_ref[i], y) + b_ref[i + 1], 0.0)
        y = jnp.maximum(conv(wstk_ref[i + 1], h) + b_ref[i + 2] + y, 0.0)

    # QHead conv1 (32 -> 1) with folded bn1, then ReLU.  Only an 8-row slice
    # of the weight/bias is used: row 0 is the real channel, rows 1..7 are
    # zero filler (kept for sublane-layout legality).
    w8 = wstk_ref[7][0:8, :]                                    # (8, 32)
    hc = jnp.maximum(conv(w8, y) + b_ref[8][0:8], 0.0)          # (8, N)

    # QHead MLP fused via per-batch block-diagonal weights: row 0 of every
    # intermediate carries the real result; rows 1..7 are harmless filler
    # (note: they become relu(bias) after the bias add — NOT zero — but only
    # row 0 is ever stored).  No reshape / transpose needed.
    npix = x_ref.shape[1]                                       # N = B*H*W
    m = hw_ref.shape[1]                                         # B*32
    wbd1 = hw_ref[0:npix, :]                                    # (N, B*32) bf16
    wbd2 = hw_ref[npix:npix + m, :]                             # (B*32, B*32) bf16
    hb = hb_ref[...]                                            # (2, B*32) f32

    z = jnp.dot(hc.astype(bf16), wbd1, preferred_element_type=f32)
    z = jnp.maximum(z + hb[0:1, :], 0.0)                        # (8, B*32)
    qacc = jnp.dot(z.astype(bf16), wbd2, preferred_element_type=f32)
    nb = q_ref.shape[1]                                         # B
    q_ref[...] = jnp.tanh(qacc[0:1, 0:nb] + hb[1:2, 0:nb])      # (1, B)


# -------------------- parameter construction --------------------
def _fold_conv_bn(key, cin, cout):
    """1x1 conv (cin->cout) + eval-mode BatchNorm folded into (W', b').

    Returns W' with shape (cout, cin) (transposed layout) and b' (cout,).
    """
    ks = jax.random.split(key, 6)
    w = 0.1 * jax.random.normal(ks[0], (cout, cin), jnp.float32)
    b = 0.1 * jax.random.normal(ks[1], (cout,), jnp.float32)
    gamma = 1.0 + 0.1 * jax.random.normal(ks[2], (cout,), jnp.float32)
    beta = 0.1 * jax.random.normal(ks[3], (cout,), jnp.float32)
    mean = 0.1 * jax.random.normal(ks[4], (cout,), jnp.float32)
    var = jax.random.uniform(ks[5], (cout,), jnp.float32, minval=0.5, maxval=1.5)
    scale = gamma / jnp.sqrt(var + EPS)
    w_f = w * scale[:, None]
    b_f = (b - mean) * scale + beta
    return w_f, b_f


def _linear(key, cin, cout):
    kw, kb = jax.random.split(key)
    w = 0.1 * jax.random.normal(kw, (cout, cin), jnp.float32)  # (out, in)
    b = 0.1 * jax.random.normal(kb, (cout,), jnp.float32)
    return w, b


def init_params(key, batch=BATCH):
    nf = NUM_Q_RES_FILTERS
    hw = R * C
    keys = jax.random.split(key, N_LAYERS + 2)

    # layer 0: 33 -> 32, layers 1..7: 32 -> 32, layer 8 (head conv): 32 -> 1.
    layer_dims = ([(nf + 1, nf), (nf, nf)]        # q_res_inp
                  + [(nf, nf)] * 6                # q_res1..q_res3
                  + [(nf, 1)])                    # QHead conv1 (+ folded bn1)

    # Layer 0 weight kept separate (wide input), layers 1..8 as a slim stack.
    w0f, b0f = _fold_conv_bn(keys[0], nf + 1, nf)
    w0 = jnp.zeros((nf, CIN_PAD), jnp.float32).at[:, :nf + 1].set(w0f)

    wstk = jnp.zeros((N_LAYERS - 1, nf, nf), jnp.float32)
    bias = jnp.zeros((N_LAYERS, nf, 1), jnp.float32)
    bias = bias.at[0, :, 0].set(b0f)
    for layer in range(1, N_LAYERS):
        cin, cout = layer_dims[layer]
        w_f, b_f = _fold_conv_bn(keys[layer], cin, cout)
        wstk = wstk.at[layer - 1, :cout, :cin].set(w_f)
        bias = bias.at[layer, :cout, 0].set(b_f)

    # Head MLP, expanded to per-batch block-diagonal form so the fused kernel
    # never needs an in-register reshape/transpose of the head activations,
    # and packed into a single bf16 weight slab + a single f32 bias slab.
    w_lin1, b_lin1 = _linear(keys[N_LAYERS], hw, 32)    # (32, 64), (32,)
    w_sc, b_sc = _linear(keys[N_LAYERS + 1], 32, 1)     # (1, 32), (1,)

    npix = batch * hw            # 128
    m = batch * 32               # 64
    head_w = jnp.zeros((npix + m, m), jnp.float32)
    head_b = jnp.zeros((2, m), jnp.float32)
    for b in range(batch):
        head_w = head_w.at[b * hw:(b + 1) * hw, b * 32:(b + 1) * 32].set(w_lin1.T)
        head_w = head_w.at[npix + b * 32:npix + (b + 1) * 32, b].set(w_sc[0])
        head_b = head_b.at[0, b * 32:(b + 1) * 32].set(b_lin1)
    head_b = head_b.at[1, :].set(b_sc[0])

    return {
        "w0": w0.astype(jnp.bfloat16),
        "wstk": wstk.astype(jnp.bfloat16),
        "bias": bias,                              # f32
        "head_w": head_w.astype(jnp.bfloat16),
        "head_b": head_b,                          # f32
    }


# -------------------- wrapper --------------------
def _to_cn(x_nchw):
    """NCHW -> (C_pad, N) pixel columns; only leading axes move, H*W stays minor."""
    B, cin, H, W = x_nchw.shape
    x_cn = jnp.transpose(x_nchw.reshape(B, cin, H * W), (1, 0, 2))
    x_cn = x_cn.reshape(cin, B * H * W)
    return jnp.concatenate(
        [x_cn, jnp.zeros((CIN_PAD - cin, B * H * W), x_cn.dtype)], axis=0)


def qmodule_forward(x_nchw, params):
    B = x_nchw.shape[0]
    x_pad = _to_cn(x_nchw)                              # (CIN_PAD, N) f32

    vmem = pl.BlockSpec(memory_space=pltpu.MemorySpace.VMEM)
    q = pl.pallas_call(
        fused_kernel,
        out_shape=jax.ShapeDtypeStruct((1, B), jnp.float32),
        in_specs=[vmem] * 6,
        out_specs=vmem,
    )(x_pad, params["w0"], params["wstk"], params["bias"],
      params["head_w"], params["head_b"])
    return q.reshape(B, 1)


# -------------------- pure-JAX reference --------------------
def reference_forward(x_nchw, params):
    hp = jax.lax.Precision.HIGHEST
    f32 = jnp.float32
    B = x_nchw.shape[0]

    def qz(a):  # mimic bf16 MXU inputs (f32 accumulate)
        return a.astype(jnp.bfloat16).astype(f32)

    def conv(w_bf16, h):
        return jnp.dot(w_bf16.astype(f32), qz(h), precision=hp)

    bias = params["bias"]
    wstk = params["wstk"]
    h = _to_cn(x_nchw)
    h = jnp.maximum(conv(params["w0"], h) + bias[0], 0.0)
    y = jnp.maximum(conv(wstk[0], h) + bias[1], 0.0)
    for i in (1, 3, 5):
        h = jnp.maximum(conv(wstk[i], y) + bias[i + 1], 0.0)
        y = jnp.maximum(conv(wstk[i + 1], h) + bias[i + 2] + y, 0.0)
    hc = jnp.maximum(conv(wstk[7][0:1, :], y) + bias[8][0:1], 0.0)   # (1, N)

    npix = B * R * C
    wbd1 = params["head_w"][:npix, :].astype(f32)
    wbd2 = params["head_w"][npix:, :].astype(f32)
    bh1 = params["head_b"][0:1, :]
    bsc = params["head_b"][1, 0]
    z = jnp.maximum(jnp.dot(qz(hc), wbd1, precision=hp) + bh1, 0.0)
    qacc = jnp.dot(qz(z), wbd2, precision=hp)
    q = jnp.tanh(qacc[0:1, 0:B] + bsc)
    return q.reshape(B, 1)


if __name__ == "__main__":
    key = jax.random.PRNGKey(0)
    kx, kp = jax.random.split(key)

    # q_input: (B, NUM_Q_RES_FILTERS + 1, R, C) in NCHW, like the PyTorch module.
    x = jax.random.normal(
        kx, (BATCH, NUM_Q_RES_FILTERS + 1, R, C), dtype=jnp.float32)
    params = init_params(kp)

    fwd = jax.jit(functools.partial(qmodule_forward, params=params))
    q = jax.block_until_ready(fwd(x))

    q_ref = jax.block_until_ready(reference_forward(x, params))

    assert q.shape == (BATCH, 1), q.shape
    assert q.dtype == jnp.float32
    assert bool(jnp.all(jnp.isfinite(q)))
    assert bool(jnp.all(jnp.abs(q) <= 1.0))          # tanh output range
    assert bool(jnp.allclose(q, q_ref, atol=1e-2, rtol=1e-2)), (q, q_ref)
    print("KERNEL_OK")
</pallas_src>

<mosaic_0001>
module attributes {stable_mosaic.version = 11 : i64} {
  func.func @fused_kernel(%arg0: memref<48x128xf32, #tpu.memory_space<vmem>>, %arg1: memref<32x48xbf16, #tpu.memory_space<vmem>>, %arg2: memref<8x32x32xbf16, #tpu.memory_space<vmem>>, %arg3: memref<9x32x1xf32, #tpu.memory_space<vmem>>, %arg4: memref<192x64xbf16, #tpu.memory_space<vmem>>, %arg5: memref<2x64xf32, #tpu.memory_space<vmem>>, %arg6: memref<1x2xf32, #tpu.memory_space<vmem>>) attributes {dimension_semantics = [], scalar_prefetch = 0 : i64, scratch_operands = 0 : i64, tpu.core_type = #tpu.core_type<tc>} {
    %c0 = arith.constant 0 : index
    %c0_0 = arith.constant 0 : index
    %0 = vector.load %arg0[%c0, %c0_0] : memref<48x128xf32, #tpu.memory_space<vmem>>, vector<48x128xf32>
    %c0_1 = arith.constant 0 : index
    %c0_2 = arith.constant 0 : index
    %1 = vector.load %arg1[%c0_1, %c0_2] : memref<32x48xbf16, #tpu.memory_space<vmem>>, vector<32x48xbf16>
    %2 = arith.truncf %0 : vector<48x128xf32> to vector<48x128xbf16>
    %cst = arith.constant dense<0.000000e+00> : vector<32x128xf32>
    %3 = tpu.matmul %1, %2, %cst {dimension_numbers = #tpu.dot_dimension_numbers<[1], [0], [0], [1], [0, 0, 1, 1], [], []>} : vector<32x48xbf16>, vector<48x128xbf16>, vector<32x128xf32> -> vector<32x128xf32>
    %c0_3 = arith.constant 0 : index
    %c0_4 = arith.constant 0 : index
    %c0_5 = arith.constant 0 : index
    %4 = vector.load %arg3[%c0_3, %c0_4, %c0_5] : memref<9x32x1xf32, #tpu.memory_space<vmem>>, vector<1x32x1xf32>
    %5 = vector.shape_cast %4 : vector<1x32x1xf32> to vector<32x1xf32>
    %6 = vector.broadcast %5 : vector<32x1xf32> to vector<32x128xf32>
    %7 = arith.addf %3, %6 : vector<32x128xf32>
    %cst_6 = arith.constant 0.000000e+00 : f32
    %8 = vector.broadcast %cst_6 : f32 to vector<32x128xf32>
    %9 = arith.maximumf %7, %8 : vector<32x128xf32>
    %c0_7 = arith.constant 0 : index
    %c0_8 = arith.constant 0 : index
    %c0_9 = arith.constant 0 : index
    %10 = vector.load %arg2[%c0_7, %c0_8, %c0_9] : memref<8x32x32xbf16, #tpu.memory_space<vmem>>, vector<1x32x32xbf16>
    %11 = vector.shape_cast %10 : vector<1x32x32xbf16> to vector<32x32xbf16>
    %12 = arith.truncf %9 : vector<32x128xf32> to vector<32x128xbf16>
    %cst_10 = arith.constant dense<0.000000e+00> : vector<32x128xf32>
    %13 = tpu.matmul %11, %12, %cst_10 {dimension_numbers = #tpu.dot_dimension_numbers<[1], [0], [0], [1], [0, 0, 1, 1], [], []>} : vector<32x32xbf16>, vector<32x128xbf16>, vector<32x128xf32> -> vector<32x128xf32>
    %c1 = arith.constant 1 : index
    %c0_11 = arith.constant 0 : index
    %c0_12 = arith.constant 0 : index
    %14 = vector.load %arg3[%c1, %c0_11, %c0_12] : memref<9x32x1xf32, #tpu.memory_space<vmem>>, vector<1x32x1xf32>
    %15 = vector.shape_cast %14 : vector<1x32x1xf32> to vector<32x1xf32>
    %16 = vector.broadcast %15 : vector<32x1xf32> to vector<32x128xf32>
    %17 = arith.addf %13, %16 : vector<32x128xf32>
    %cst_13 = arith.constant 0.000000e+00 : f32
    %18 = vector.broadcast %cst_13 : f32 to vector<32x128xf32>
    %19 = arith.maximumf %17, %18 : vector<32x128xf32>
    %c1_14 = arith.constant 1 : index
    %c0_15 = arith.constant 0 : index
    %c0_16 = arith.constant 0 : index
    %20 = vector.load %arg2[%c1_14, %c0_15, %c0_16] : memref<8x32x32xbf16, #tpu.memory_space<vmem>>, vector<1x32x32xbf16>
    %21 = vector.shape_cast %20 : vector<1x32x32xbf16> to vector<32x32xbf16>
    %22 = arith.truncf %19 : vector<32x128xf32> to vector<32x128xbf16>
    %cst_17 = arith.constant dense<0.000000e+00> : vector<32x128xf32>
    %23 = tpu.matmul %21, %22, %cst_17 {dimension_numbers = #tpu.dot_dimension_numbers<[1], [0], [0], [1], [0, 0, 1, 1], [], []>} : vector<32x32xbf16>, vector<32x128xbf16>, vector<32x128xf32> -> vector<32x128xf32>
    %c2 = arith.constant 2 : index
    %c0_18 = arith.constant 0 : index
    %c0_19 = arith.constant 0 : index
    %24 = vector.load %arg3[%c2, %c0_18, %c0_19] : memref<9x32x1xf32, #tpu.memory_space<vmem>>, vector<1x32x1xf32>
    %25 = vector.shape_cast %24 : vector<1x32x1xf32> to vector<32x1xf32>
    %26 = vector.broadcast %25 : vector<32x1xf32> to vector<32x128xf32>
    %27 = arith.addf %23, %26 : vector<32x128xf32>
    %cst_20 = arith.constant 0.000000e+00 : f32
    %28 = vector.broadcast %cst_20 : f32 to vector<32x128xf32>
    %29 = arith.maximumf %27, %28 : vector<32x128xf32>
    %c2_21 = arith.constant 2 : index
    %c0_22 = arith.constant 0 : index
    %c0_23 = arith.constant 0 : index
    %30 = vector.load %arg2[%c2_21, %c0_22, %c0_23] : memref<8x32x32xbf16, #tpu.memory_space<vmem>>, vector<1x32x32xbf16>
    %31 = vector.shape_cast %30 : vector<1x32x32xbf16> to vector<32x32xbf16>
    %32 = arith.truncf %29 : vector<32x128xf32> to vector<32x128xbf16>
    %cst_24 = arith.constant dense<0.000000e+00> : vector<32x128xf32>
    %33 = tpu.matmul %31, %32, %cst_24 {dimension_numbers = #tpu.dot_dimension_numbers<[1], [0], [0], [1], [0, 0, 1, 1], [], []>} : vector<32x32xbf16>, vector<32x128xbf16>, vector<32x128xf32> -> vector<32x128xf32>
    %c3 = arith.constant 3 : index
    %c0_25 = arith.constant 0 : index
    %c0_26 = arith.constant 0 : index
    %34 = vector.load %arg3[%c3, %c0_25, %c0_26] : memref<9x32x1xf32, #tpu.memory_space<vmem>>, vector<1x32x1xf32>
    %35 = vector.shape_cast %34 : vector<1x32x1xf32> to vector<32x1xf32>
    %36 = vector.broadcast %35 : vector<32x1xf32> to vector<32x128xf32>
    %37 = arith.addf %33, %36 : vector<32x128xf32>
    %38 = arith.addf %37, %19 : vector<32x128xf32>
    %cst_27 = arith.constant 0.000000e+00 : f32
    %39 = vector.broadcast %cst_27 : f32 to vector<32x128xf32>
    %40 = arith.maximumf %38, %39 : vector<32x128xf32>
    %c3_28 = arith.constant 3 : index
    %c0_29 = arith.constant 0 : index
    %c0_30 = arith.constant 0 : index
    %41 = vector.load %arg2[%c3_28, %c0_29, %c0_30] : memref<8x32x32xbf16, #tpu.memory_space<vmem>>, vector<1x32x32xbf16>
    %42 = vector.shape_cast %41 : vector<1x32x32xbf16> to vector<32x32xbf16>
    %43 = arith.truncf %40 : vector<32x128xf32> to vector<32x128xbf16>
    %cst_31 = arith.constant dense<0.000000e+00> : vector<32x128xf32>
    %44 = tpu.matmul %42, %43, %cst_31 {dimension_numbers = #tpu.dot_dimension_numbers<[1], [0], [0], [1], [0, 0, 1, 1], [], []>} : vector<32x32xbf16>, vector<32x128xbf16>, vector<32x128xf32> -> vector<32x128xf32>
    %c4 = arith.constant 4 : index
    %c0_32 = arith.constant 0 : index
    %c0_33 = arith.constant 0 : index
    %45 = vector.load %arg3[%c4, %c0_32, %c0_33] : memref<9x32x1xf32, #tpu.memory_space<vmem>>, vector<1x32x1xf32>
    %46 = vector.shape_cast %45 : vector<1x32x1xf32> to vector<32x1xf32>
    %47 = vector.broadcast %46 : vector<32x1xf32> to vector<32x128xf32>
    %48 = arith.addf %44, %47 : vector<32x128xf32>
    %cst_34 = arith.constant 0.000000e+00 : f32
    %49 = vector.broadcast %cst_34 : f32 to vector<32x128xf32>
    %50 = arith.maximumf %48, %49 : vector<32x128xf32>
    %c4_35 = arith.constant 4 : index
    %c0_36 = arith.constant 0 : index
    %c0_37 = arith.constant 0 : index
    %51 = vector.load %arg2[%c4_35, %c0_36, %c0_37] : memref<8x32x32xbf16, #tpu.memory_space<vmem>>, vector<1x32x32xbf16>
    %52 = vector.shape_cast %51 : vector<1x32x32xbf16> to vector<32x32xbf16>
    %53 = arith.truncf %50 : vector<32x128xf32> to vector<32x128xbf16>
    %cst_38 = arith.constant dense<0.000000e+00> : vector<32x128xf32>
    %54 = tpu.matmul %52, %53, %cst_38 {dimension_numbers = #tpu.dot_dimension_numbers<[1], [0], [0], [1], [0, 0, 1, 1], [], []>} : vector<32x32xbf16>, vector<32x128xbf16>, vector<32x128xf32> -> vector<32x128xf32>
    %c5 = arith.constant 5 : index
    %c0_39 = arith.constant 0 : index
    %c0_40 = arith.constant 0 : index
    %55 = vector.load %arg3[%c5, %c0_39, %c0_40] : memref<9x32x1xf32, #tpu.memory_space<vmem>>, vector<1x32x1xf32>
    %56 = vector.shape_cast %55 : vector<1x32x1xf32> to vector<32x1xf32>
    %57 = vector.broadcast %56 : vector<32x1xf32> to vector<32x128xf32>
    %58 = arith.addf %54, %57 : vector<32x128xf32>
    %59 = arith.addf %58, %40 : vector<32x128xf32>
    %cst_41 = arith.constant 0.000000e+00 : f32
    %60 = vector.broadcast %cst_41 : f32 to vector<32x128xf32>
    %61 = arith.maximumf %59, %60 : vector<32x128xf32>
    %c5_42 = arith.constant 5 : index
    %c0_43 = arith.constant 0 : index
    %c0_44 = arith.constant 0 : index
    %62 = vector.load %arg2[%c5_42, %c0_43, %c0_44] : memref<8x32x32xbf16, #tpu.memory_space<vmem>>, vector<1x32x32xbf16>
    %63 = vector.shape_cast %62 : vector<1x32x32xbf16> to vector<32x32xbf16>
    %64 = arith.truncf %61 : vector<32x128xf32> to vector<32x128xbf16>
    %cst_45 = arith.constant dense<0.000000e+00> : vector<32x128xf32>
    %65 = tpu.matmul %63, %64, %cst_45 {dimension_numbers = #tpu.dot_dimension_numbers<[1], [0], [0], [1], [0, 0, 1, 1], [], []>} : vector<32x32xbf16>, vector<32x128xbf16>, vector<32x128xf32> -> vector<32x128xf32>
    %c6 = arith.constant 6 : index
    %c0_46 = arith.constant 0 : index
    %c0_47 = arith.constant 0 : index
    %66 = vector.load %arg3[%c6, %c0_46, %c0_47] : memref<9x32x1xf32, #tpu.memory_space<vmem>>, vector<1x32x1xf32>
    %67 = vector.shape_cast %66 : vector<1x32x1xf32> to vector<32x1xf32>
    %68 = vector.broadcast %67 : vector<32x1xf32> to vector<32x128xf32>
    %69 = arith.addf %65, %68 : vector<32x128xf32>
    %cst_48 = arith.constant 0.000000e+00 : f32
    %70 = vector.broadcast %cst_48 : f32 to vector<32x128xf32>
    %71 = arith.maximumf %69, %70 : vector<32x128xf32>
    %c6_49 = arith.constant 6 : index
    %c0_50 = arith.constant 0 : index
    %c0_51 = arith.constant 0 : index
    %72 = vector.load %arg2[%c6_49, %c0_50, %c0_51] : memref<8x32x32xbf16, #tpu.memory_space<vmem>>, vector<1x32x32xbf16>
    %73 = vector.shape_cast %72 : vector<1x32x32xbf16> to vector<32x32xbf16>
    %74 = arith.truncf %71 : vector<32x128xf32> to vector<32x128xbf16>
    %cst_52 = arith.constant dense<0.000000e+00> : vector<32x128xf32>
    %75 = tpu.matmul %73, %74, %cst_52 {dimension_numbers = #tpu.dot_dimension_numbers<[1], [0], [0], [1], [0, 0, 1, 1], [], []>} : vector<32x32xbf16>, vector<32x128xbf16>, vector<32x128xf32> -> vector<32x128xf32>
    %c7 = arith.constant 7 : index
    %c0_53 = arith.constant 0 : index
    %c0_54 = arith.constant 0 : index
    %76 = vector.load %arg3[%c7, %c0_53, %c0_54] : memref<9x32x1xf32, #tpu.memory_space<vmem>>, vector<1x32x1xf32>
    %77 = vector.shape_cast %76 : vector<1x32x1xf32> to vector<32x1xf32>
    %78 = vector.broadcast %77 : vector<32x1xf32> to vector<32x128xf32>
    %79 = arith.addf %75, %78 : vector<32x128xf32>
    %80 = arith.addf %79, %61 : vector<32x128xf32>
    %cst_55 = arith.constant 0.000000e+00 : f32
    %81 = vector.broadcast %cst_55 : f32 to vector<32x128xf32>
    %82 = arith.maximumf %80, %81 : vector<32x128xf32>
    %c7_56 = arith.constant 7 : index
    %c0_57 = arith.constant 0 : index
    %c0_58 = arith.constant 0 : index
    %83 = vector.load %arg2[%c7_56, %c0_57, %c0_58] : memref<8x32x32xbf16, #tpu.memory_space<vmem>>, vector<1x32x32xbf16>
    %84 = vector.shape_cast %83 : vector<1x32x32xbf16> to vector<32x32xbf16>
    %85 = vector.extract_strided_slice %84 {offsets = [0, 0], sizes = [8, 32], strides = [1, 1]} : vector<32x32xbf16> to vector<8x32xbf16>
    %86 = arith.truncf %82 : vector<32x128xf32> to vector<32x128xbf16>
    %cst_59 = arith.constant dense<0.000000e+00> : vector<8x128xf32>
    %87 = tpu.matmul %85, %86, %cst_59 {dimension_numbers = #tpu.dot_dimension_numbers<[1], [0], [0], [1], [0, 0, 1, 1], [], []>} : vector<8x32xbf16>, vector<32x128xbf16>, vector<8x128xf32> -> vector<8x128xf32>
    %c8 = arith.constant 8 : index
    %c0_60 = arith.constant 0 : index
    %c0_61 = arith.constant 0 : index
    %88 = vector.load %arg3[%c8, %c0_60, %c0_61] : memref<9x32x1xf32, #tpu.memory_space<vmem>>, vector<1x32x1xf32>
    %89 = vector.shape_cast %88 : vector<1x32x1xf32> to vector<32x1xf32>
    %90 = vector.extract_strided_slice %89 {offsets = [0, 0], sizes = [8, 1], strides = [1, 1]} : vector<32x1xf32> to vector<8x1xf32>
    %91 = vector.broadcast %90 : vector<8x1xf32> to vector<8x128xf32>
    %92 = arith.addf %87, %91 : vector<8x128xf32>
    %cst_62 = arith.constant 0.000000e+00 : f32
    %93 = vector.broadcast %cst_62 : f32 to vector<8x128xf32>
    %94 = arith.maximumf %92, %93 : vector<8x128xf32>
    %c0_63 = arith.constant 0 : index
    %c0_64 = arith.constant 0 : index
    %95 = vector.load %arg4[%c0_63, %c0_64] : memref<192x64xbf16, #tpu.memory_space<vmem>>, vector<128x64xbf16>
    %c128 = arith.constant 128 : index
    %c0_65 = arith.constant 0 : index
    %96 = vector.load %arg4[%c128, %c0_65] : memref<192x64xbf16, #tpu.memory_space<vmem>>, vector<64x64xbf16>
    %c0_66 = arith.constant 0 : index
    %c0_67 = arith.constant 0 : index
    %97 = vector.load %arg5[%c0_66, %c0_67] : memref<2x64xf32, #tpu.memory_space<vmem>>, vector<2x64xf32>
    %98 = arith.truncf %94 : vector<8x128xf32> to vector<8x128xbf16>
    %cst_68 = arith.constant dense<0.000000e+00> : vector<8x64xf32>
    %99 = tpu.matmul %98, %95, %cst_68 {dimension_numbers = #tpu.dot_dimension_numbers<[1], [0], [0], [1], [0, 0, 1, 1], [], []>} : vector<8x128xbf16>, vector<128x64xbf16>, vector<8x64xf32> -> vector<8x64xf32>
    %100 = vector.extract_strided_slice %97 {offsets = [0, 0], sizes = [1, 64], strides = [1, 1]} : vector<2x64xf32> to vector<1x64xf32>
    %101 = vector.broadcast %100 : vector<1x64xf32> to vector<8x64xf32>
    %102 = arith.addf %99, %101 : vector<8x64xf32>
    %cst_69 = arith.constant 0.000000e+00 : f32
    %103 = vector.broadcast %cst_69 : f32 to vector<8x64xf32>
    %104 = arith.maximumf %102, %103 : vector<8x64xf32>
    %105 = arith.truncf %104 : vector<8x64xf32> to vector<8x64xbf16>
    %cst_70 = arith.constant dense<0.000000e+00> : vector<8x64xf32>
    %106 = tpu.matmul %105, %96, %cst_70 {dimension_numbers = #tpu.dot_dimension_numbers<[1], [0], [0], [1], [0, 0, 1, 1], [], []>} : vector<8x64xbf16>, vector<64x64xbf16>, vector<8x64xf32> -> vector<8x64xf32>
    %107 = vector.extract_strided_slice %106 {offsets = [0, 0], sizes = [1, 2], strides = [1, 1]} : vector<8x64xf32> to vector<1x2xf32>
    %108 = vector.extract_strided_slice %97 {offsets = [1, 0], sizes = [1, 2], strides = [1, 1]} : vector<2x64xf32> to vector<1x2xf32>
    %109 = arith.addf %107, %108 : vector<1x2xf32>
    %110 = math.tanh %109 : vector<1x2xf32>
    %c0_71 = arith.constant 0 : index
    %c0_72 = arith.constant 0 : index
    %111 = vector.load %arg6[%c0_71, %c0_72] : memref<1x2xf32, #tpu.memory_space<vmem>>, vector<1x2xf32>
    tpu.vector_store %arg6[%c0_71, %c0_72], %110 {strides = array<i32>} : memref<1x2xf32, #tpu.memory_space<vmem>>, vector<1x2xf32>,
    return
  }
}

</mosaic_0001>

<bundles_post_ra>
// kernel: qmodule_forward.1
= control target key start
LH: loop header
LB: loop body
LE: loop exit
PB: predicated region body
PF: predicated region fallthrough
CT: control target
= control target key end

     0   :  { %11 = vsyncpa [#allocation3], 0  ;;  %s1822_s0 = inlined_call_operand.vmem [shape: f32[48,128], index: 0, kind: input, shape index: {}]   ;;  %s1823_s1 = inlined_call_operand.hbm [shape: bf16[32,48], index: 1, kind: input, shape index: {}]   ;;  %s1824_s2 = inlined_call_operand.vmem [shape: bf16[8,32,32], index: 2, kind: input, shape index: {}]   ;;  %s1825_s3 = inlined_call_operand.vmem [shape: f32[9,32,1], index: 3, kind: input, shape index: {}]   ;;  %s1826_s4 = inlined_call_operand.hbm [shape: bf16[192,64], index: 4, kind: input, shape index: {}]   ;;  %s1827_s5 = inlined_call_operand.vmem [shape: f32[2,64], index: 5, kind: input, shape index: {}]   ;;  %s1828_s6 = inlined_call_operand.hbm [shape: f32[1,2], index: 6, kind: output, shape index: {}]  }
   0x1   :  { %12 = vsyncpa [#allocation6], 0 }
   0x2   :  { %13 = vsyncpa [#allocation4], 0  ;;  %s1513_s21 = smov [#allocation2]   ;;  %s1441_s25 = scalar_lea.hbm %s1823_s1, 256 }
   0x3   :  { %s21_s22 = sshll.u32 %s1513_s21, 4  ;;  %p1442_p0 = scmp.ne.s32.totalorder %s1823_s1, %s1441_s25  ;;  %s22_s22 = int_to_ptr.vmem [resolvable:$true] %s21_s22 }
   0x4   :  { %p1445_p1 = scmp.lt.u32.totalorder %s1441_s25, %s1823_s1 }
   0x6   :  { %p1447_p2 = pnand %p1445_p1, %p1442_p0 }
   0x8   :  { %1450 = shalt.err (!%p1447_p2)
}
   0x9   :  { %s1451_s30 = scalar_lea.vmem %s22_s22, 256  ;;  %p1456_p4 = scmp.lt.s32.totalorder %s22_s22, %s22_s22 }
   0xa   :  { %p1452_p3 = scmp.ne.s32.totalorder %s22_s22, %s1451_s30  ;;  %p1457_p5 = scmp.lt.s32.totalorder %s1451_s30, %s1451_s30 }
   0xc   :  { %p1458_p6 = por %p1457_p5, %p1456_p4 }
   0xe   :  { %p1459_p7 = pnand %p1458_p6, %p1452_p3 }
  0x10   :  { %1462 = shalt.err (!%p1459_p7)
}
  0x11   :  { %s1514_s7 = smov 64   ;;  %s1515_s8 = smov 4  }
  0x12   :  { %27 = dma.hbm_to_vmem [thread:$0]  %s1823_s1, 256, %s22_s22, [#allocation3], %s1514_s7, %s1514_s7, %s1515_s8  }
  0x13   :  { %s1516_s11 = smov [#allocation5]   ;;  %s1463_s15 = scalar_lea.hbm %s1826_s4, 1536 }
  0x14   :  { %s37_s12 = sshll.u32 %s1516_s11, 4  ;;  %p1464_p8 = scmp.ne.s32.totalorder %s1826_s4, %s1463_s15  ;;  %s38_s12 = int_to_ptr.vmem [resolvable:$true] %s37_s12 }
  0x15   :  { %p1467_p9 = scmp.lt.u32.totalorder %s1463_s15, %s1826_s4 }
  0x17   :  { %p1469_p10 = pnand %p1467_p9, %p1464_p8 }
  0x19   :  { %1472 = shalt.err (!%p1469_p10)
}
  0x1a   :  { %s1473_s20 = scalar_lea.vmem %s38_s12, 1536  ;;  %p1478_p12 = scmp.lt.s32.totalorder %s38_s12, %s38_s12 }
  0x1b   :  { %p1474_p11 = scmp.ne.s32.totalorder %s38_s12, %s1473_s20  ;;  %p1479_p13 = scmp.lt.s32.totalorder %s1473_s20, %s1473_s20 }
  0x1d   :  { %p1480_p0 = por %p1479_p13, %p1478_p12 }
  0x1f   :  { %p1481_p1 = pnand %p1480_p0, %p1474_p11 }
  0x21   :  { %1484 = shalt.err (!%p1481_p1)
}
  0x22   :  { %43 = dma.hbm_to_vmem [thread:$0]  %s1826_s4, 1536, %s38_s12, [#allocation6], %s1514_s7, %s1514_s7, %s1515_s8  }
  0x23   :  { %1507 = dma.done.wait [#allocation3], 256  }
  0x24   :  { %1508 = vsyncadd [#allocation3], 4294967040 }
  0x25   :  { %1509 = dma.done.wait [#allocation6], 1536  }
  0x26   :  { %1510 = vsyncadd [#allocation6], 4294965760  ;;  %v1517_v0 = vmov 0   ;;  %v53_v1 = vld [vmem:[%s1822_s0] sm:$0xff]  ;;  %v54_v2 = vld [vmem:[%s1822_s0 + $0x8] sm:$0xff]  ;;  %vm100_vm0 = vcmask 392192  }
  0x27   :  { %1409 = vset.pattern.permute.xlu0 %v1517_v0  ;;  %1410 = vset.pattern.permute.xlu1 %v1517_v0  ;;  %v55_v3 = vld [vmem:[%s1822_s0 + $0x10] sm:$0xff]  ;;  %v63_v4 = vpack.c.bf16 %v54_v2, %v53_v1  ;;  %v56_v5 = vld [vmem:[%s1822_s0 + $0x18] sm:$0xff]  ;;  %v57_v6 = vld [vmem:[%s1822_s0 + $0x20] sm:$0xff]  ;;  %vm201_vm1 = vcmask 261120   ;;  %vm1519_vm2 = vmmov 0   ;;  %vm1078_vm3 = vcmask 523264  }
  0x28   :  { %v58_v7 = vld [vmem:[%s1822_s0 + $0x28] sm:$0xff]  ;;  %v64_v8 = vpack.c.bf16 %v56_v5, %v55_v3  ;;  %v1411_v9 = vld [vmem:[#allocation2] sm:$0xff]   ;;  %v68_v11 = vld [vmem:[%s1825_s3 + $0x10] sm:$0xff]  ;;  %s1520_s21 = smov [#allocation7]   ;;  %vm1127_vm4 = vcmask 8192  }
  0x29   :  { %1295 = vmatprep.subr.bf16.mxu0 %v63_v4  ;;  %1301 = vmatprep.mubr.msk.bf16.mxu0 %vm100_vm0, %v1411_v9  ;;  %v66_v10 = vld [vmem:[%s1825_s3] sm:$0xff]  ;;  %v65_v12 = vpack.c.bf16 %v58_v7, %v57_v6  ;;  %v67_v13 = vld [vmem:[%s1825_s3 + $0x8] sm:$0xff]  ;;  %v69_v14 = vld [vmem:[%s1825_s3 + $0x18] sm:$0xff]  ;;  %s1135_s22 = sshll.u32 %s1520_s21, 4  ;;  %s1136_s22 = int_to_ptr.vmem [resolvable:$true] %s1135_s22 }
  0x2a   :  { %1296 = vmatpush3.bf16.msra.mxu0 %v63_v4  ;;  %72 = vperm.xlu0 %1409, %v66_v10   ;;  %v1149_v15 = vld [vmem:[%s1825_s3 + $0x20] sm:$0xff]  ;;  %v1412_v16 = vld [vmem:[#allocation2 + $0x8] sm:$0xff]   ;;  %v1151_v18 = vld [vmem:[%s1825_s3 + $0x30] sm:$0xff]  ;;  %s1489_s23 = scalar_lea.vmem %s1136_s22, 32  ;;  %p1490_p3 = scmp.lt.s32.totalorder %s1136_s22, %s1136_s22 }
  0x2b   :  { %1297 = vmatprep.subr.bf16.mxu0 %v64_v8  ;;  %82 = vperm.xlu1 %1410, %v68_v11   ;;  %v1150_v17 = vld [vmem:[%s1825_s3 + $0x28] sm:$0xff]  ;;  %v1152_v19 = vld [vmem:[%s1825_s3 + $0x38] sm:$0xff]  ;;  %v1161_v20 = vld [vmem:[%s1825_s3 + $0x40] sm:$0xff] }
  0x2c   :  { %v1162_v21 = vld [vmem:[%s1825_s3 + $0x48] sm:$0xff]  ;;  %v1163_v22 = vld [vmem:[%s1825_s3 + $0x50] sm:$0xff]  ;;  %v1164_v23 = vld [vmem:[%s1825_s3 + $0x58] sm:$0xff] }
  0x2d   :  { %v1173_v24 = vld [vmem:[%s1825_s3 + $0x60] sm:$0xff]  ;;  %v1174_v25 = vld [vmem:[%s1825_s3 + $0x68] sm:$0xff]  ;;  %v1175_v26 = vld [vmem:[%s1825_s3 + $0x70] sm:$0xff] }
  0x2e   :  { %1298 = vmatpush3.bf16.msra.mxu0 %v64_v8  ;;  %77 = vperm.xlu0 %1409, %v67_v13   ;;  %v1176_v27 = vld [vmem:[%s1825_s3 + $0x78] sm:$0xff]  ;;  %v1185_v28 = vld [vmem:[%s1825_s3 + $0x80] sm:$0xff]  ;;  %v1186_v29 = vld [vmem:[%s1825_s3 + $0x88] sm:$0xff] }
  0x2f   :  { %1299 = vmatprep.subr.bf16.mxu0 %v65_v12  ;;  %87 = vperm.xlu1 %1410, %v69_v14   ;;  %v1187_v30 = vld [vmem:[%s1825_s3 + $0x90] sm:$0xff]  ;;  %v1188_v31 = vld [vmem:[%s1825_s3 + $0x98] sm:$0xff]  ;;  %v1197_v32 = vld [vmem:[%s1825_s3 + $0xa0] sm:$0xff] }
  0x30   :  { %v1198_v33 = vld [vmem:[%s1825_s3 + $0xa8] sm:$0xff]  ;;  %v1199_v34 = vld [vmem:[%s1825_s3 + $0xb0] sm:$0xff]  ;;  %v1200_v35 = vld [vmem:[%s1825_s3 + $0xb8] sm:$0xff] }
  0x31   :  { %v1209_v36 = vld [vmem:[%s1825_s3 + $0xc0] sm:$0xff]  ;;  %v1210_v37 = vld [vmem:[%s1825_s3 + $0xc8] sm:$0xff]  ;;  %v1211_v38 = vld [vmem:[%s1825_s3 + $0xd0] sm:$0xff] }
  0x32   :  { %1300 = vmatpush3.bf16.msra.mxu0 %v65_v12  ;;  %173 = vperm.xlu0 %1409, %v1149_v15   ;;  %v1212_v39 = vld [vmem:[%s1825_s3 + $0xd8] sm:$0xff]  ;;  %v1221_v40 = vld [vmem:[%s1825_s3 + $0xe0] sm:$0xff]  ;;  %v1222_v41 = vld [vmem:[%s1825_s3 + $0xe8] sm:$0xff] }
  0x33   :  { %178 = vperm.xlu1 %1410, %v1150_v17   ;;  %v1223_v42 = vld [vmem:[%s1825_s3 + $0xf0] sm:$0xff]  ;;  %v1224_v43 = vld [vmem:[%s1825_s3 + $0xf8] sm:$0xff]  ;;  %v1230_v44 = vld [vmem:[%s1825_s3 + $0x100] sm:$0xff] }
  0x34   :  { %v1413_v45 = vld [vmem:[%s1824_s2] sm:$0xff]   ;;  %v1414_v0 = vld [vmem:[%s1824_s2 + $0x8] sm:$0xff]   ;;  %v1415_v1 = vld [vmem:[%s1824_s2 + $0x10] sm:$0xff]  }
  0x35   :  { %1302 = vmatmul.mubr.msk.bf16.vlgmr.msra.gmra.mrb[0].mxu0 %vm100_vm0, %v1412_v16  ;;  %1309 = vmatprep.mubr.msk.bf16.mxu1 %vm201_vm1, %v1413_v45 }
  0x36   :  { %183 = vperm.xlu0 %1409, %v1151_v18  }
  0x37   :  { %188 = vperm.xlu1 %1410, %v1152_v19  }
  0x3a   :  { %275 = vperm.xlu0 %1409, %v1161_v20   ;;  %v1416_v20 = vld [vmem:[%s1824_s2 + $0x18] sm:$0xff]  }
  0x3b   :  { %280 = vperm.xlu1 %1410, %v1162_v21   ;;  %v1417_v21 = vld [vmem:[%s1824_s2 + $0x20] sm:$0xff]  }
  0x3e   :  { %285 = vperm.xlu0 %1409, %v1163_v22  }
  0x3f   :  { %290 = vperm.xlu1 %1410, %v1164_v23  }
  0x42   :  { %376 = vperm.xlu0 %1409, %v1173_v24  }
  0x43   :  { %381 = vperm.xlu1 %1410, %v1174_v25  }
  0x46   :  { %386 = vperm.xlu0 %1409, %v1175_v26  }
  0x47   :  { %391 = vperm.xlu1 %1410, %v1176_v27  }
  0x4a   :  { %481 = vperm.xlu0 %1409, %v1185_v28  }
  0x4b   :  { %486 = vperm.xlu1 %1410, %v1186_v29  }
  0x4e   :  { %491 = vperm.xlu0 %1409, %v1187_v30  }
  0x4f   :  { %496 = vperm.xlu1 %1410, %v1188_v31  }
  0x52   :  { %582 = vperm.xlu0 %1409, %v1197_v32  }
  0x53   :  { %587 = vperm.xlu1 %1410, %v1198_v33  }
  0x56   :  { %592 = vperm.xlu0 %1409, %v1199_v34  }
  0x57   :  { %597 = vperm.xlu1 %1410, %v1200_v35  }
  0x5a   :  { %687 = vperm.xlu0 %1409, %v1209_v36  }
  0x5b   :  { %692 = vperm.xlu1 %1410, %v1210_v37  }
  0x5e   :  { %697 = vperm.xlu0 %1409, %v1211_v38  }
  0x5f   :  { %702 = vperm.xlu1 %1410, %v1212_v39  }
  0x62   :  { %788 = vperm.xlu0 %1409, %v1221_v40   ;;  %v1418_v40 = vld [vmem:[%s1824_s2 + $0x28] sm:$0xff]  }
  0x63   :  { %793 = vperm.xlu1 %1410, %v1222_v41   ;;  %v1419_v41 = vld [vmem:[%s1824_s2 + $0x30] sm:$0xff]  }
  0x66   :  { %798 = vperm.xlu0 %1409, %v1223_v42  }
  0x67   :  { %803 = vperm.xlu1 %1410, %v1224_v43  }
  0x6a   :  { %887 = vperm.xlu0 %1409, %v1230_v44  }
  0xa9   :  { %v73_v47 = vpop.permute.xlu0 %72 }
  0xaa   :  { %v83_v46 = vpop.permute.xlu1 %82 }
  0xad   :  { %v78_v54 = vpop.permute.xlu0 %77 }
  0xae   :  { %v88_v51 = vpop.permute.xlu1 %87 }
  0xb1   :  { %v174_v3 = vpop.permute.xlu0 %173 }
  0xb2   :  { %v179_v2 = vpop.permute.xlu1 %178 }
  0xb5   :  { %v184_v9 = vpop.permute.xlu0 %183 }
  0xb6   :  { %v189_v6 = vpop.permute.xlu1 %188 }
  0xb9   :  { %v276_v22 = vpop.permute.xlu0 %275 }
  0xba   :  { %v281_v23 = vpop.permute.xlu1 %280 }
  0xbd   :  { %v286_v24 = vpop.permute.xlu0 %285 }
  0xbe   :  { %v291_v28 = vpop.permute.xlu1 %290 }
  0xc1   :  { %v377_v42 = vpop.permute.xlu0 %376 }
  0xc2   :  { %v382_v43 = vpop.permute.xlu1 %381 }
  0xc5   :  { %v387_v45 = vpop.permute.xlu0 %386 }
 0x108   :  { %v1303_v48 = vpop.f32.mrb[0].mxu0 }
 0x109   :  { %v150_v49 = vadd.f32 %v1303_v48, %v83_v46  ;;  %v141_v50 = vpop.f32.mrb[1].mxu0 }
 0x10a   :  { %v142_v52 = vadd.f32 %v141_v50, %v73_v47  ;;  %v1304_v53 = vpop.f32.mrb[2].mxu0  ;;  %v392_v47 = vpop.permute.xlu1 %391 }
 0x10b   :  { %v153_v55 = vadd.f32 %v1304_v53, %v88_v51  ;;  %v144_v56 = vpop.f32.mrb[3].mxu0  ;;  %v158_v58 = vmax.f32 %v150_v49, 0.0 }
 0x10c   :  { %v145_v57 = vadd.f32 %v144_v56, %v78_v54  ;;  %v156_v60 = vmax.f32 %v142_v52, 0.0 }
 0x10d   :  { %v159_v59 = vmax.f32 %v153_v55, 0.0 }
 0x10e   :  { %v157_v61 = vmax.f32 %v145_v57, 0.0 }
 0x10f   :  { %v165_v62 = vpack.c.bf16 %v159_v59, %v158_v58 }
 0x110   :  { %v164_v63 = vpack.c.bf16 %v157_v61, %v156_v60 }
 0x112   :  { %1305 = vmatprep.subr.bf16.mxu1 %v164_v63 }
 0x113   :  { %1306 = vmatpush3.bf16.msra.mxu1 %v164_v63 }
 0x114   :  { %1307 = vmatprep.subr.bf16.mxu1 %v165_v62 }
 0x117   :  { %1308 = vmatpush3.bf16.msra.mxu1 %v165_v62 }
 0x11a   :  { %1310 = vmatmul.mubr.msk.bf16.vlgmr.msra.gmra.mrb[0].mxu1 %vm201_vm1, %v1414_v0  ;;  %v1420_v0 = vld [vmem:[%s1824_s2 + $0x38] sm:$0xff]  }
 0x11b   :  { %1317 = vmatprep.mubr.msk.bf16.mxu1 %vm201_vm1, %v1415_v1  ;;  %v1421_v1 = vld [vmem:[%s1824_s2 + $0x40] sm:$0xff]  }
 0x11c   :  { %1341 = vmatprep.mubr.msk.bf16.mxu0 %vm201_vm1, %v1421_v1  ;;  %v1518_v1 = vmov 0.0  }
 0x1ed   :  { %v1311_v4 = vpop.f32.mrb[0].mxu1 }
 0x1ee   :  { %v242_v5 = vpop.f32.mrb[1].mxu1  ;;  %v251_v12 = vadd.f32 %v1311_v4, %v184_v9 }
 0x1ef   :  { %v243_v7 = vadd.f32 %v242_v5, %v174_v3  ;;  %v1312_v8 = vpop.f32.mrb[2].mxu1  ;;  %v487_v3 = vpop.permute.xlu1 %486 }
 0x1f0   :  { %v254_v10 = vadd.f32 %v1312_v8, %v189_v6  ;;  %v245_v11 = vpop.f32.mrb[3].mxu1  ;;  %v259_v17 = vmax.f32 %v251_v12, 0.0 }
 0x1f1   :  { %v246_v13 = vadd.f32 %v245_v11, %v179_v2  ;;  %v257_v14 = vmax.f32 %v243_v7, 0.0  ;;  %v482_v2 = vpop.permute.xlu0 %481 }
 0x1f2   :  { %v260_v15 = vmax.f32 %v254_v10, 0.0 }
 0x1f3   :  { %v258_v16 = vmax.f32 %v246_v13, 0.0  ;;  %v497_v8 = vpop.permute.xlu1 %496 }
 0x1f4   :  { %v267_v19 = vpack.c.bf16 %v260_v15, %v259_v17 }
 0x1f5   :  { %v266_v18 = vpack.c.bf16 %v258_v16, %v257_v14  ;;  %v492_v4 = vpop.permute.xlu0 %491 }
 0x1f7   :  { %1313 = vmatprep.subr.bf16.mxu1 %v266_v18 }
 0x1f8   :  { %1314 = vmatpush3.bf16.msra.mxu1 %v266_v18 }
 0x1f9   :  { %1315 = vmatprep.subr.bf16.mxu1 %v267_v19 }
 0x1fc   :  { %1316 = vmatpush3.bf16.msra.mxu1 %v267_v19 }
 0x1ff   :  { %1318 = vmatmul.mubr.msk.bf16.vlgmr.msra.gmra.mrb[4].mxu1 %vm201_vm1, %v1416_v20  ;;  %v1422_v20 = vld [vmem:[%s1824_s2 + $0x48] sm:$0xff]  }
 0x200   :  { %1325 = vmatprep.mubr.msk.bf16.mxu1 %vm201_vm1, %v1417_v21  ;;  %v1423_v21 = vld [vmem:[%s1824_s2 + $0x50] sm:$0xff]  }
 0x2d2   :  { %v1319_v25 = vpop.f32.mrb[4].mxu1 }
 0x2d3   :  { %v352_v26 = vadd.f32 %v1319_v25, %v286_v24  ;;  %v343_v27 = vpop.f32.mrb[5].mxu1 }
 0x2d4   :  { %v344_v29 = vadd.f32 %v343_v27, %v276_v22  ;;  %v1320_v30 = vpop.f32.mrb[6].mxu1  ;;  %v583_v22 = vpop.permute.xlu0 %582 }
 0x2d5   :  { %v355_v31 = vadd.f32 %v1320_v30, %v291_v28  ;;  %v346_v32 = vpop.f32.mrb[7].mxu1  ;;  %v360_v34 = vmax.f32 %v352_v26, 0.0 }
 0x2d6   :  { %v347_v33 = vadd.f32 %v346_v32, %v281_v23  ;;  %v358_v36 = vmax.f32 %v344_v29, 0.0  ;;  %v588_v23 = vpop.permute.xlu1 %587 }
 0x2d7   :  { %v361_v35 = vmax.f32 %v355_v31, 0.0 }
 0x2d8   :  { %v359_v37 = vmax.f32 %v347_v33, 0.0  ;;  %v593_v25 = vpop.permute.xlu0 %592 }
 0x2d9   :  { %v368_v38 = vpack.c.bf16 %v361_v35, %v360_v34 }
 0x2da   :  { %v367_v39 = vpack.c.bf16 %v359_v37, %v358_v36  ;;  %v598_v27 = vpop.permute.xlu1 %597 }
 0x2dc   :  { %1321 = vmatprep.subr.bf16.mxu1 %v367_v39 }
 0x2dd   :  { %1322 = vmatpush3.bf16.msra.mxu1 %v367_v39 }
 0x2de   :  { %1323 = vmatprep.subr.bf16.mxu1 %v368_v38 }
 0x2e1   :  { %1324 = vmatpush3.bf16.msra.mxu1 %v368_v38 }
 0x2e4   :  { %1326 = vmatmul.mubr.msk.bf16.vlgmr.msra.gmra.mrb[8].mxu1 %vm201_vm1, %v1418_v40 }
 0x2e5   :  { %1333 = vmatprep.mubr.msk.bf16.mxu1 %vm201_vm1, %v1419_v41 }
 0x3b7   :  { %v1327_v44 = vpop.f32.mrb[8].mxu1 }
 0x3b8   :  { %v444_v46 = vpop.f32.mrb[9].mxu1  ;;  %v453_v48 = vadd.f32 %v1327_v44, %v387_v45  ;;  %v1424_v44 = vld [vmem:[%s1824_s2 + $0x58] sm:$0xff]   ;;  %v1425_v45 = vld [vmem:[%s1824_s2 + $0x60] sm:$0xff]  }
 0x3b9   :  { %v445_v49 = vadd.f32 %v444_v46, %v377_v42  ;;  %v1328_v50 = vpop.f32.mrb[10].mxu1  ;;  %v688_v46 = vpop.permute.xlu0 %687 }
 0x3ba   :  { %v456_v51 = vadd.f32 %v1328_v50, %v392_v47  ;;  %v447_v52 = vpop.f32.mrb[11].mxu1  ;;  %v461_v56 = vadd.f32 %v453_v48, %v259_v17  ;;  %v693_v47 = vpop.permute.xlu1 %692 }
 0x3bb   :  { %v459_v53 = vadd.f32 %v445_v49, %v257_v14  ;;  %v448_v54 = vadd.f32 %v447_v52, %v382_v43 }
 0x3bc   :  { %v462_v55 = vadd.f32 %v456_v51, %v260_v15  ;;  %v465_v61 = vmax.f32 %v461_v56, 0.0 }
 0x3bd   :  { %v460_v57 = vadd.f32 %v448_v54, %v258_v16  ;;  %v463_v58 = vmax.f32 %v459_v53, 0.0  ;;  %v698_v48 = vpop.permute.xlu0 %697 }
 0x3be   :  { %v466_v59 = vmax.f32 %v462_v55, 0.0  ;;  %v703_v52 = vpop.permute.xlu1 %702 }
 0x3bf   :  { %v464_v60 = vmax.f32 %v460_v57, 0.0 }
 0x3c0   :  { %v473_v63 = vpack.c.bf16 %v466_v59, %v465_v61 }
 0x3c1   :  { %v472_v62 = vpack.c.bf16 %v464_v60, %v463_v58 }
 0x3c3   :  { %1329 = vmatprep.subr.bf16.mxu1 %v472_v62 }
 0x3c4   :  { %1330 = vmatpush3.bf16.msra.mxu1 %v472_v62 }
 0x3c5   :  { %1331 = vmatprep.subr.bf16.mxu1 %v473_v63 }
 0x3c8   :  { %1332 = vmatpush3.bf16.msra.mxu1 %v473_v63 }
 0x3cb   :  { %1334 = vmatmul.mubr.msk.bf16.vlgmr.msra.gmra.mrb[12].mxu1 %vm201_vm1, %v1420_v0  ;;  %v1426_v0 = vld [vmem:[%s1824_s2 + $0x68] sm:$0xff]  }
 0x3cc   :  { %1349 = vmatprep.mubr.msk.bf16.mxu1 %vm201_vm1, %v1423_v21 }
 0x49e   :  { %v1335_v5 = vpop.f32.mrb[12].mxu1 }
 0x49f   :  { %v558_v6 = vadd.f32 %v1335_v5, %v492_v4  ;;  %v549_v7 = vpop.f32.mrb[13].mxu1  ;;  %v1429_v4 = vld [vmem:[#allocation5 + $0x10] sm:$0xff]   ;;  %v1430_v5 = vld [vmem:[#allocation5 + $0x18] sm:$0xff]  }
 0x4a0   :  { %v550_v9 = vadd.f32 %v549_v7, %v482_v2  ;;  %v1336_v10 = vpop.f32.mrb[14].mxu1  ;;  %v1427_v2 = vld [vmem:[#allocation5] sm:$0xff]   ;;  %v1432_v7 = vld [vmem:[#allocation5 + $0x28] sm:$0xff]  }
 0x4a1   :  { %v561_v11 = vadd.f32 %v1336_v10, %v497_v8  ;;  %v552_v12 = vpop.f32.mrb[15].mxu1  ;;  %v566_v14 = vmax.f32 %v558_v6, 0.0  ;;  %v1431_v6 = vld [vmem:[#allocation5 + $0x20] sm:$0xff]   ;;  %v789_v8 = vpop.permute.xlu0 %788 }
 0x4a2   :  { %v553_v13 = vadd.f32 %v552_v12, %v487_v3  ;;  %v564_v16 = vmax.f32 %v550_v9, 0.0  ;;  %v1428_v3 = vld [vmem:[#allocation5 + $0x8] sm:$0xff]   ;;  %v794_v9 = vpop.permute.xlu1 %793 }
 0x4a3   :  { %v567_v15 = vmax.f32 %v561_v11, 0.0 }
 0x4a4   :  { %v565_v17 = vmax.f32 %v553_v13, 0.0 }
 0x4a5   :  { %v574_v18 = vpack.c.bf16 %v567_v15, %v566_v14  ;;  %v799_v10 = vpop.permute.xlu0 %798 }
 0x4a6   :  { %v573_v19 = vpack.c.bf16 %v565_v17, %v564_v16  ;;  %v804_v14 = vpop.permute.xlu1 %803 }
 0x4a8   :  { %1337 = vmatprep.subr.bf16.mxu0 %v573_v19 }
 0x4a9   :  { %1338 = vmatpush3.bf16.msra.mxu0 %v573_v19 }
 0x4aa   :  { %1339 = vmatprep.subr.bf16.mxu0 %v574_v18 }
 0x4ad   :  { %1340 = vmatpush3.bf16.msra.mxu0 %v574_v18 }
 0x4b0   :  { %1342 = vmatmul.mubr.msk.bf16.vlgmr.msra.gmra.mrb[4].mxu0 %vm201_vm1, %v1422_v20 }
 0x4b1   :  { %1357 = vmatprep.mubr.msk.bf16.mxu0 %vm201_vm1, %v1425_v45  ;;  %v960_v45 = vlaneseq }
 0x583   :  { %v1343_v24 = vpop.f32.mrb[4].mxu0 }
 0x584   :  { %v650_v26 = vpop.f32.mrb[5].mxu0  ;;  %v659_v28 = vadd.f32 %v1343_v24, %v593_v25 }
 0x585   :  { %v651_v29 = vadd.f32 %v650_v26, %v583_v22  ;;  %v1344_v30 = vpop.f32.mrb[6].mxu0 }
 0x586   :  { %v662_v31 = vadd.f32 %v1344_v30, %v598_v27  ;;  %v653_v32 = vpop.f32.mrb[7].mxu0  ;;  %v1747_v36 = vadd.f32 %v659_v28, %v465_v61  ;;  %v1229_v30 = vld [vmem:[%s1824_s2 + $0x70] sm:$0xf] }
 0x587   :  { %v1743_v33 = vadd.f32 %v651_v29, %v463_v58  ;;  %v654_v34 = vadd.f32 %v653_v32, %v588_v23  ;;  %v1434_v32 = vld [vmem:[#allocation5 + $0x38] sm:$0xff]  }
 0x588   :  { %v1745_v35 = vadd.f32 %v662_v31, %v466_v59  ;;  %v671_v41 = vmax.f32 %v1747_v36, 0.0  ;;  %v1433_v31 = vld [vmem:[#allocation5 + $0x30] sm:$0xff]  }
 0x589   :  { %v1749_v37 = vadd.f32 %v654_v34, %v464_v60  ;;  %v669_v38 = vmax.f32 %v1743_v33, 0.0  ;;  %v1435_v33 = vld [vmem:[#allocation5 + $0x40] sm:$0xff]   ;;  %v1436_v34 = vld [vmem:[#allocation5 + $0x48] sm:$0xff]  }
 0x58a   :  { %v672_v39 = vmax.f32 %v1745_v35, 0.0  ;;  %v888_v35 = vpop.permute.xlu0 %887 }
 0x58b   :  { %v670_v40 = vmax.f32 %v1749_v37, 0.0 }
 0x58c   :  { %v679_v43 = vpack.c.bf16 %v672_v39, %v671_v41 }
 0x58d   :  { %v678_v42 = vpack.c.bf16 %v670_v40, %v669_v38 }
 0x58f   :  { %1345 = vmatprep.subr.bf16.mxu1 %v678_v42 }
 0x590   :  { %1346 = vmatpush3.bf16.msra.mxu1 %v678_v42 }
 0x591   :  { %1347 = vmatprep.subr.bf16.mxu1 %v679_v43 }
 0x594   :  { %1348 = vmatpush3.bf16.msra.mxu1 %v679_v43  ;;  %v1437_v43 = vld [vmem:[#allocation5 + $0x50] sm:$0xff]  }
 0x595   :  { %1361 = vmatprep.subr.bf16.mxu1 %v1518_v1 }
 0x597   :  { %1350 = vmatmul.mubr.msk.bf16.vlgmr.msra.gmra.mrb[16].mxu1 %vm201_vm1, %v1424_v44  ;;  %v1438_v44 = vld [vmem:[#allocation5 + $0x58] sm:$0xff]  }
 0x598   :  { %1365 = vmatprep.mubr.msk.bf16.mxu1 %vm1519_vm2, %v1518_v1 }
 0x66a   :  { %v1351_v49 = vpop.f32.mrb[16].mxu1 }
 0x66b   :  { %v764_v50 = vadd.f32 %v1351_v49, %v698_v48  ;;  %v755_v51 = vpop.f32.mrb[17].mxu1  ;;  %v958_v48 = vld [vmem:[%s1827_s5] sm:$0x3]  ;;  %s1485_s5 = scalar_lea.vmem %s1136_s22, 16 }
 0x66c   :  { %v756_v53 = vadd.f32 %v755_v51, %v688_v46  ;;  %v1352_v54 = vpop.f32.mrb[18].mxu1  ;;  %v961_v46 = vshrl.u32 %v960_v45, 7  ;;  %p1486_p2 = scmp.ne.s32.totalorder %s1136_s22, %s1485_s5  ;;  %p1491_p4 = scmp.lt.s32.totalorder %s1489_s23, %s1485_s5 }
 0x66d   :  { %v767_v55 = vadd.f32 %v1352_v54, %v703_v52  ;;  %v758_v56 = vpop.f32.mrb[19].mxu1  ;;  %v772_v58 = vmax.f32 %v764_v50, 0.0 }
 0x66e   :  { %v759_v57 = vadd.f32 %v758_v56, %v693_v47  ;;  %v770_v60 = vmax.f32 %v756_v53, 0.0  ;;  %v962_v47 = vsub.s32 0, %v961_v46  ;;  %p1492_p5 = por %p1491_p4, %p1490_p3 }
 0x66f   :  { %v773_v59 = vmax.f32 %v767_v55, 0.0 }
 0x670   :  { %v771_v61 = vmax.f32 %v759_v57, 0.0  ;;  %v963_v49 = vrot.slane %v958_v48, %v962_v47  ;;  %v1123_v57 = vrot.slane %v958_v48, 1  ;;  %p1493_p6 = pnand %p1492_p5, %p1486_p2 }
 0x671   :  { %v780_v62 = vpack.c.bf16 %v773_v59, %v772_v58 }
 0x672   :  { %v779_v63 = vpack.c.bf16 %v771_v61, %v770_v60 }
 0x674   :  { %1353 = vmatprep.subr.bf16.mxu0 %v779_v63 }
 0x675   :  { %1354 = vmatpush3.bf16.msra.mxu0 %v779_v63 }
 0x676   :  { %1355 = vmatprep.subr.bf16.mxu0 %v780_v62 }
 0x679   :  { %1356 = vmatpush3.bf16.msra.mxu0 %v780_v62 }
 0x67a   :  { %1369 = vmatprep.subr.bf16.mxu0 %v1518_v1 }
 0x67c   :  { %1358 = vmatmul.mubr.msk.bf16.vlgmr.msra.gmra.mrb[8].mxu0 %vm201_vm1, %v1426_v0 }
 0x67d   :  { %1385 = vmatprep.mubr.msk.bf16.mxu0 %vm1519_vm2, %v1518_v1  ;;  %1370 = vmatpush3.bf16.msra.mxu0 %v1427_v2 }
 0x67e   :  { %1371 = vmatprep.subr.bf16.mxu0 %v1518_v1 }
 0x681   :  { %1372 = vmatpush3.bf16.msra.mxu0 %v1428_v3 }
 0x682   :  { %1373 = vmatprep.subr.bf16.mxu0 %v1518_v1 }
 0x685   :  { %1374 = vmatpush3.bf16.msra.mxu0 %v1429_v4 }
 0x686   :  { %1375 = vmatprep.subr.bf16.mxu0 %v1518_v1 }
 0x689   :  { %1376 = vmatpush3.bf16.msra.mxu0 %v1430_v5 }
 0x68a   :  { %1377 = vmatprep.subr.bf16.mxu0 %v1518_v1 }
 0x68d   :  { %1378 = vmatpush3.bf16.msra.mxu0 %v1431_v6 }
 0x68e   :  { %1379 = vmatprep.subr.bf16.mxu0 %v1518_v1 }
 0x691   :  { %1380 = vmatpush3.bf16.msra.mxu0 %v1432_v7 }
 0x692   :  { %1381 = vmatprep.subr.bf16.mxu0 %v1518_v1 }
 0x695   :  { %1382 = vmatpush3.bf16.msra.mxu0 %v1433_v31 }
 0x696   :  { %1383 = vmatprep.subr.bf16.mxu0 %v1518_v1 }
 0x699   :  { %1384 = vmatpush3.bf16.msra.mxu0 %v1434_v32 }
 0x74f   :  { %v1359_v11 = vpop.f32.mrb[8].mxu0 }
 0x750   :  { %v865_v12 = vadd.f32 %v1359_v11, %v799_v10  ;;  %v856_v13 = vpop.f32.mrb[9].mxu0 }
 0x751   :  { %v857_v15 = vadd.f32 %v856_v13, %v789_v8  ;;  %v1360_v16 = vpop.f32.mrb[10].mxu0 }
 0x752   :  { %v873_v17 = vadd.f32 %v865_v12, %v671_v41  ;;  %v868_v18 = vadd.f32 %v1360_v16, %v804_v14  ;;  %v859_v19 = vpop.f32.mrb[11].mxu0 }
 0x753   :  { %v871_v20 = vadd.f32 %v857_v15, %v669_v38  ;;  %v860_v21 = vadd.f32 %v859_v19, %v794_v9 }
 0x754   :  { %v874_v22 = vadd.f32 %v868_v18, %v672_v39  ;;  %v877_v24 = vmax.f32 %v873_v17, 0.0 }
 0x755   :  { %v872_v23 = vadd.f32 %v860_v21, %v670_v40  ;;  %v875_v26 = vmax.f32 %v871_v20, 0.0 }
 0x756   :  { %v878_v25 = vmax.f32 %v874_v22, 0.0 }
 0x757   :  { %v876_v27 = vmax.f32 %v872_v23, 0.0 }
 0x758   :  { %v882_v28 = vpack.c.bf16 %v878_v25, %v877_v24 }
 0x759   :  { %v881_v29 = vpack.c.bf16 %v876_v27, %v875_v26 }
 0x75b   :  { %1362 = vmatpush3.bf16.msra.mxu1 %v881_v29 }
 0x75c   :  { %1363 = vmatprep.subr.bf16.mxu1 %v1518_v1 }
 0x75f   :  { %1364 = vmatpush3.bf16.msra.mxu1 %v882_v28 }
 0x760   :  { %1389 = vmatprep.subr.bf16.mxu1 %v1518_v1 }
 0x762   :  { %1366 = vmatmul.mubr.msk.bf16.vlgmr.msra.gmra.mrb[20].mxu1 %vm201_vm1, %v1229_v30 }
 0x763   :  { %1397 = vmatprep.mubr.msk.bf16.mxu1 %vm1519_vm2, %v1518_v1  ;;  %1390 = vmatpush3.bf16.msra.mxu1 %v1435_v33 }
 0x764   :  { %1391 = vmatprep.subr.bf16.mxu1 %v1518_v1 }
 0x767   :  { %1392 = vmatpush3.bf16.msra.mxu1 %v1436_v34 }
 0x768   :  { %1393 = vmatprep.subr.bf16.mxu1 %v1518_v1 }
 0x76b   :  { %1394 = vmatpush3.bf16.msra.mxu1 %v1437_v43 }
 0x76c   :  { %1395 = vmatprep.subr.bf16.mxu1 %v1518_v1 }
 0x76f   :  { %1396 = vmatpush3.bf16.msra.mxu1 %v1438_v44 }
 0x835   :  { %v927_v36 = vpop.f32.mrb[20].mxu1 }
 0x836   :  { %v928_v37 = vadd.f32 %v927_v36, %v888_v35  ;;  %v1367_v38 = vpop.f32.mrb[21].mxu1 }
 0x837   :  { %v930_v39 = vpop.f32.mrb[22].mxu1 }
 0x838   :  { %v933_v40 = vmax.f32 %v928_v37, 0.0  ;;  %v1368_v41 = vpop.f32.mrb[23].mxu1 }
 0x83a   :  { %v959_v42 = vpack.c.bf16 %v933_v40, %v933_v40 }
 0x83c   :  { %1386 = vmatmul.mubr.bf16.vlgmr.msra.gmra.mrb[12].mxu0 %v959_v42 }
 0x90f   :  { %v1046_v50 = vpop.f32.mrb[12].mxu0 }
 0x910   :  { %v1047_v51 = vadd.f32 %v1046_v50, %v963_v49  ;;  %v1387_v52 = vpop.f32.mrb[13].mxu0 }
 0x911   :  { %v1049_v53 = vpop.f32.mrb[14].mxu0 }
 0x912   :  { %v1052_v54 = vmax.f32 %v1047_v51, 0.0  ;;  %v1388_v55 = vpop.f32.mrb[15].mxu0 }
 0x914   :  { %v1053_v56 = vpack.c.bf16 %v1052_v54, %v1052_v54 }
 0x916   :  { %1398 = vmatmul.mubr.msk.bf16.vlgmr.msra.gmra.mrb[24].mxu1 %vm1078_vm3, %v1053_v56 }
 0x9e9   :  { %v1116_v58 = vpop.f32.mrb[24].mxu1 }
 0x9ea   :  { %v1125_v59 = vadd.f32 %v1123_v57, %v1116_v58  ;;  %v1399_v60 = vpop.f32.mrb[25].mxu1 }
 0x9eb   :  { %v1119_v61 = vpop.f32.mrb[26].mxu1 }
 0x9ec   :  { %1439 = vtanh.f32 %v1125_v59  ;;  %v1400_v62 = vpop.f32.mrb[27].mxu1 }
 0x9f6   :  { %v1440_v63 = vpop.eup %1439 }
 0x9f7   :  { %1128 = vst.msk [vmem:[#allocation7] sm:$0x1] %vm1127_vm4, %v1440_v63 }
 0x9f8   :  { %1496 = shalt.err (!%p1493_p6)
}
 0x9f9   :  { %s1497_s26 = scalar_lea.hbm %s1828_s6, 16 }
 0x9fa   :  { %p1498_p7 = scmp.ne.s32.totalorder %s1828_s6, %s1497_s26  ;;  %p1501_p8 = scmp.lt.u32.totalorder %s1497_s26, %s1828_s6 }
 0x9fc   :  { %p1503_p9 = pnand %p1501_p8, %p1498_p7 }
 0x9fe   :  { %1506 = shalt.err (!%p1503_p9)
}
 0x9ff   :  { %1138 = dma.vmem_to_hbm [thread:$0]  %s1136_s22, 16, %s1828_s6, [#allocation4]  }
 0xa00   :  { %1511 = dma.done.wait [#allocation4], 16  }
 0xa01   :  { %1512 = vsyncadd [#allocation4], 4294967280 }
 0xa02   :  { %1142 = vsyncpa [#allocation3], 1 }
 0xa03   :  { %1143 = vsyncpa [#allocation6], 1 }
 0xa04   :  { %1144 = vsyncpa [#allocation4], 1 }

</bundles_post_ra>
